<compile_context>
chip_gen: v6e
topology: v6e:2x2x1
jax: 0.10.0
libtpu: 0.0.40
codegen_flags: <defaults>
</compile_context>

<pallas_src>
import functools
import math

import jax
import jax.numpy as jnp
from jax.experimental import pallas as pl
from jax.experimental.pallas import tpu as pltpu


def _round_up(n, m):
    return ((n + m - 1) // m) * m


def _pad_cols(a, cols):
    """Zero-pad the last dim of `a` to `cols` (no-op if already that size)."""
    pad = cols - a.shape[-1]
    if pad == 0:
        return a
    widths = [(0, 0)] * (a.ndim - 1) + [(0, pad)]
    return jnp.pad(a, widths)


# ---------------------------------------------------------------------------
# Shared in-kernel gate math (lane-dense, 128-aligned gate slabs).
# ---------------------------------------------------------------------------
def _gru_gates(x, h, wi, wh, bi, bhn, hp):
    """x: (B, Ip) [param dtype], h: (B, Hp) f32, wi: (Ip, 3Hp), wh: (Hp, 3Hp),
    bi: (1, 3Hp) f32 (r/z input+hidden biases pre-summed), bhn: (1, Hp) f32."""
    dt = wi.dtype
    # Two gate-fused MXU matmuls with f32 accumulation.
    gi = jnp.dot(x.astype(dt), wi, preferred_element_type=jnp.float32) + bi
    gh = jnp.dot(h.astype(dt), wh, preferred_element_type=jnp.float32)

    # 128-aligned lane slices (whole vregs, no cross-lane movement).
    i_r, i_z, i_n = gi[:, 0:hp], gi[:, hp:2 * hp], gi[:, 2 * hp:3 * hp]
    h_r, h_z, h_n = gh[:, 0:hp], gh[:, hp:2 * hp], gh[:, 2 * hp:3 * hp]

    r = jax.nn.sigmoid(i_r + h_r)                 # EUP
    z = jax.nn.sigmoid(i_z + h_z)
    n = jnp.tanh(i_n + r * (h_n + bhn))           # b_hn only on the n gate

    # h' = (1 - z) * n + z * h  ==  n + z * (h - n)
    return n + z * (h - n)


# ---------------------------------------------------------------------------
# Single-step kernel (matches the PyTorch module's forward exactly).
# ---------------------------------------------------------------------------
def _gru_cell_kernel(x_ref, h_ref, wi_ref, wh_ref, bi_ref, bhn_ref, o_ref, *, hp):
    o_ref[...] = _gru_gates(
        x_ref[...], h_ref[...], wi_ref[...], wh_ref[...], bi_ref[...], bhn_ref[...], hp
    ).astype(o_ref.dtype)


# ---------------------------------------------------------------------------
# Sequence kernel: grid=(T,), weights resident in VMEM, hidden state carried in
# a VMEM scratch across grid steps.
# ---------------------------------------------------------------------------
def _gru_seq_kernel(x_ref, h0_ref, wi_ref, wh_ref, bi_ref, bhn_ref,
                    hseq_ref, h_scr, *, hp):
    @pl.when(pl.program_id(0) == 0)
    def _():
        h_scr[...] = h0_ref[...]

    h_new = _gru_gates(
        x_ref[...], h_scr[...], wi_ref[...], wh_ref[...], bi_ref[...], bhn_ref[...], hp)
    h_scr[...] = h_new
    hseq_ref[...] = h_new.astype(hseq_ref.dtype)


# ---------------------------------------------------------------------------
# Host-side one-time packing.
# ---------------------------------------------------------------------------
def pack_gru_params(p, input_size, hidden_size, param_dtype=jnp.float32):
    """Gate-concat weights (r|z|n along lanes), pad H -> Hp and I -> Ip to 128
    multiples, pre-sum r/z biases, keep b_hn separate, cast weights to
    `param_dtype` (bf16 halves weight DMA; accumulation stays f32)."""
    H, I = hidden_size, input_size
    hp = _round_up(H, 128)
    ip = _round_up(I, 128)

    def pad2(a, rows, cols):
        return jnp.pad(a, ((0, rows - a.shape[0]), (0, cols - a.shape[1])))

    wi = jnp.concatenate(
        [pad2(p["w_ir"], ip, hp), pad2(p["w_iz"], ip, hp), pad2(p["w_in"], ip, hp)],
        axis=1).astype(param_dtype)
    wh = jnp.concatenate(
        [pad2(p["w_hr"], hp, hp), pad2(p["w_hz"], hp, hp), pad2(p["w_hn"], hp, hp)],
        axis=1).astype(param_dtype)

    bi = jnp.concatenate(
        [pad2(p["b_ir"] + p["b_hr"], 1, hp),
         pad2(p["b_iz"] + p["b_hz"], 1, hp),
         pad2(p["b_in"], 1, hp)], axis=1).astype(jnp.float32)
    bhn = pad2(p["b_hn"], 1, hp).astype(jnp.float32)

    return {"wi": wi, "wh": wh, "bi": bi, "bhn": bhn,
            "hp": hp, "ip": ip, "H": H, "I": I}


def _vmem_limit_bytes(packed, batch):
    """Raise the scoped-VMEM limit only when the resident working set needs it."""
    hp, ip = packed["hp"], packed["ip"]
    wbytes = jnp.dtype(packed["wi"].dtype).itemsize
    need = (ip * 3 * hp + hp * 3 * hp) * wbytes          # resident weight slabs
    need += (3 * hp + hp) * 4                            # biases
    need += 2 * batch * (ip * wbytes + 2 * hp * 4)       # double-buffered x / out tiles
    need += 2 * batch * hp * 4                           # h0 tile + scratch
    need = int(need * 1.5)                               # headroom for temporaries
    default_scoped = 32 * 1024 * 1024
    if need <= default_scoped:
        return None
    return min(need, 64 * 1024 * 1024)                   # stay under v7x physical VMEM


# ---------------------------------------------------------------------------
# Wrappers.
# ---------------------------------------------------------------------------
def gru_cell_pallas(x, hx, packed):
    """Single GRU step. x: (B, I), hx: (B, H) -> (B, H), all f32 in/out."""
    B = x.shape[0]
    H, hp, ip = packed["H"], packed["hp"], packed["ip"]

    x_p = _pad_cols(x, ip).astype(packed["wi"].dtype)   # lane-pad + cast once
    h_p = _pad_cols(hx, hp)                              # stays f32 (blend in f32)

    out = pl.pallas_call(
        functools.partial(_gru_cell_kernel, hp=hp),
        out_shape=jax.ShapeDtypeStruct((B, hp), jnp.float32),
        in_specs=[pl.BlockSpec(memory_space=pltpu.VMEM)] * 6,
        out_specs=pl.BlockSpec(memory_space=pltpu.VMEM),
        compiler_params=pltpu.CompilerParams(
            vmem_limit_bytes=_vmem_limit_bytes(packed, B)),
    )(x_p, h_p, packed["wi"], packed["wh"], packed["bi"], packed["bhn"])

    return out[:, :H] if hp != H else out


def gru_sequence_pallas(xs, h0, packed):
    """Apply the GRU cell over a whole sequence inside ONE pallas_call.

    xs: (T, B, I), h0: (B, H) -> (hidden_seq (T, B, H), h_last (B, H)).
    Weights are DMA'd once (constant index_map) and stay resident in VMEM; the
    hidden state is carried in a VMEM scratch across grid steps."""
    T, B, _ = xs.shape
    H, hp, ip = packed["H"], packed["hp"], packed["ip"]

    xs_p = _pad_cols(xs, ip).astype(packed["wi"].dtype)  # pad + cast once per sequence
    h0_p = _pad_cols(h0, hp)                              # f32, padded lanes stay 0

    hseq = pl.pallas_call(
        functools.partial(_gru_seq_kernel, hp=hp),
        out_shape=jax.ShapeDtypeStruct((T, B, hp), jnp.float32),
        grid=(T,),
        in_specs=[
            pl.BlockSpec((None, B, ip), lambda t: (t, 0, 0)),    # x_t
            pl.BlockSpec((B, hp),       lambda t: (0, 0)),       # h0 (read at t==0)
            pl.BlockSpec((ip, 3 * hp),  lambda t: (0, 0)),       # wi  (resident)
            pl.BlockSpec((hp, 3 * hp),  lambda t: (0, 0)),       # wh  (resident)
            pl.BlockSpec((1, 3 * hp),   lambda t: (0, 0)),       # bi  (resident)
            pl.BlockSpec((1, hp),       lambda t: (0, 0)),       # b_hn(resident)
        ],
        out_specs=pl.BlockSpec((None, B, hp), lambda t: (t, 0, 0)),
        scratch_shapes=[pltpu.VMEM((B, hp), jnp.float32)],        # carried hidden
        compiler_params=pltpu.CompilerParams(
            dimension_semantics=("arbitrary",),                   # time is sequential
            vmem_limit_bytes=_vmem_limit_bytes(packed, B)),
    )(xs_p, h0_p, packed["wi"], packed["wh"], packed["bi"], packed["bhn"])

    hseq = hseq[..., :H] if hp != H else hseq
    return hseq, hseq[-1]


# ---------------------------------------------------------------------------
# Module wrapper (JAX/Pallas equivalent of ModuleWrapperIgnores2ndArg_gru).
# ---------------------------------------------------------------------------
class ModuleWrapperIgnores2ndArgGRU:
    """Wraps a GRUCell; forward(hx, x, dummy) ignores dummy and returns the new
    hidden state, exactly like the PyTorch wrapper."""

    def __init__(self, input_size, hidden_size, key, param_dtype=jnp.float32):
        k = 1.0 / math.sqrt(hidden_size)
        keys = jax.random.split(key, 12)
        names = ["w_ir", "w_iz", "w_in", "w_hr", "w_hz", "w_hn",
                 "b_ir", "b_iz", "b_in", "b_hr", "b_hz", "b_hn"]
        shapes = [(input_size, hidden_size)] * 3 + [(hidden_size, hidden_size)] * 3 \
                 + [(1, hidden_size)] * 6
        # Per-gate params in (in, out) layout (pre-transposed vs PyTorch's W^T).
        self.params = {
            n: jax.random.uniform(kk, s, jnp.float32, minval=-k, maxval=k)
            for n, kk, s in zip(names, keys, shapes)
        }
        self.packed = pack_gru_params(self.params, input_size, hidden_size, param_dtype)

    def forward(self, hx, x, dummy_arg=None):
        assert dummy_arg is not None, "dummy_arg is required but was None"
        # Matches `self.module(x, hx)` for an nn.GRUCell.
        return gru_cell_pallas(x, hx, self.packed)

    def forward_sequence(self, hx, xs, dummy_arg=None):
        """Recurrent convenience: whole (T, B, I) sequence in one pallas_call."""
        assert dummy_arg is not None, "dummy_arg is required but was None"
        return gru_sequence_pallas(xs, hx, self.packed)


# ---------------------------------------------------------------------------
# Pure-JAX reference (per-gate, unfused) for correctness checks.
# ---------------------------------------------------------------------------
def _gru_cell_ref(x, hx, p):
    i_r = x @ p["w_ir"] + p["b_ir"]
    i_z = x @ p["w_iz"] + p["b_iz"]
    i_n = x @ p["w_in"] + p["b_in"]
    h_r = hx @ p["w_hr"] + p["b_hr"]
    h_z = hx @ p["w_hz"] + p["b_hz"]
    h_n = hx @ p["w_hn"] + p["b_hn"]
    r = jax.nn.sigmoid(i_r + h_r)
    z = jax.nn.sigmoid(i_z + h_z)
    n = jnp.tanh(i_n + r * h_n)
    return (1.0 - z) * n + z * hx


if __name__ == "__main__":
    batch = 8
    input_size = 32
    hidden_size = 32
    seq_len = 8

    key = jax.random.PRNGKey(0)
    k_mod, k_x, k_h, k_seq = jax.random.split(key, 4)

    module = ModuleWrapperIgnores2ndArgGRU(input_size, hidden_size, k_mod)

    x = jax.random.normal(k_x, (batch, input_size), jnp.float32)
    hx = jax.random.normal(k_h, (batch, hidden_size), jnp.float32)
    dummy = jnp.zeros((), jnp.float32)  # required-but-unused dummy arg

    # --- single step (module semantics), f32 packing: tight check ----------
    out = jax.block_until_ready(module.forward(hx, x, dummy_arg=dummy))
    ref = _gru_cell_ref(x, hx, module.params)
    assert out.shape == (batch, hidden_size)
    assert jnp.allclose(out, ref, atol=1e-5, rtol=1e-5), "single-step f32 mismatch"

    # --- single step, bf16-packed weights/activations (half the DMA bytes) --
    packed_bf16 = pack_gru_params(module.params, input_size, hidden_size, jnp.bfloat16)
    out_bf16 = jax.block_until_ready(gru_cell_pallas(x, hx, packed_bf16))
    assert jnp.allclose(out_bf16, ref, atol=3e-2, rtol=3e-2), "single-step bf16 mismatch"

    # --- whole sequence in one pallas_call (weights resident in VMEM) -------
    xs = jax.random.normal(k_seq, (seq_len, batch, input_size), jnp.float32)
    hseq, h_last = module.forward_sequence(hx, xs, dummy_arg=dummy)
    hseq = jax.block_until_ready(hseq)

    h_ref = hx
    ref_steps = []
    for t in range(seq_len):
        h_ref = _gru_cell_ref(xs[t], h_ref, module.params)
        ref_steps.append(h_ref)
    ref_seq = jnp.stack(ref_steps)

    assert hseq.shape == (seq_len, batch, hidden_size)
    assert jnp.allclose(hseq, ref_seq, atol=5e-4, rtol=5e-4), "sequence mismatch"
    assert jnp.allclose(h_last, ref_seq[-1], atol=5e-4, rtol=5e-4), "final-h mismatch"

    print("KERNEL_OK")
</pallas_src>

<mosaic_0001>
module attributes {stable_mosaic.version = 11 : i64} {
  func.func @_gru_cell_kernel(%arg0: memref<8x128xf32, #tpu.memory_space<vmem>>, %arg1: memref<8x128xf32, #tpu.memory_space<vmem>>, %arg2: memref<128x384xf32, #tpu.memory_space<vmem>>, %arg3: memref<128x384xf32, #tpu.memory_space<vmem>>, %arg4: memref<1x384xf32, #tpu.memory_space<vmem>>, %arg5: memref<1x128xf32, #tpu.memory_space<vmem>>, %arg6: memref<8x128xf32, #tpu.memory_space<vmem>>) attributes {dimension_semantics = [], scalar_prefetch = 0 : i64, scratch_operands = 0 : i64, tpu.core_type = #tpu.core_type<tc>} {
    %c0 = arith.constant 0 : index
    %c0_0 = arith.constant 0 : index
    %0 = vector.load %arg0[%c0, %c0_0] : memref<8x128xf32, #tpu.memory_space<vmem>>, vector<8x128xf32>
    %c0_1 = arith.constant 0 : index
    %c0_2 = arith.constant 0 : index
    %1 = vector.load %arg1[%c0_1, %c0_2] : memref<8x128xf32, #tpu.memory_space<vmem>>, vector<8x128xf32>
    %c0_3 = arith.constant 0 : index
    %c0_4 = arith.constant 0 : index
    %2 = vector.load %arg2[%c0_3, %c0_4] : memref<128x384xf32, #tpu.memory_space<vmem>>, vector<128x384xf32>
    %c0_5 = arith.constant 0 : index
    %c0_6 = arith.constant 0 : index
    %3 = vector.load %arg3[%c0_5, %c0_6] : memref<128x384xf32, #tpu.memory_space<vmem>>, vector<128x384xf32>
    %c0_7 = arith.constant 0 : index
    %c0_8 = arith.constant 0 : index
    %4 = vector.load %arg4[%c0_7, %c0_8] : memref<1x384xf32, #tpu.memory_space<vmem>>, vector<1x384xf32>
    %c0_9 = arith.constant 0 : index
    %c0_10 = arith.constant 0 : index
    %5 = vector.load %arg5[%c0_9, %c0_10] : memref<1x128xf32, #tpu.memory_space<vmem>>, vector<1x128xf32>
    %cst = arith.constant dense<0.000000e+00> : vector<8x384xf32>
    %6 = tpu.matmul %0, %2, %cst {dimension_numbers = #tpu.dot_dimension_numbers<[1], [0], [0], [1], [0, 0, 1, 1], [], []>} : vector<8x128xf32>, vector<128x384xf32>, vector<8x384xf32> -> vector<8x384xf32>
    %7 = vector.broadcast %4 : vector<1x384xf32> to vector<8x384xf32>
    %8 = arith.addf %6, %7 : vector<8x384xf32>
    %cst_11 = arith.constant dense<0.000000e+00> : vector<8x384xf32>
    %9 = tpu.matmul %1, %3, %cst_11 {dimension_numbers = #tpu.dot_dimension_numbers<[1], [0], [0], [1], [0, 0, 1, 1], [], []>} : vector<8x128xf32>, vector<128x384xf32>, vector<8x384xf32> -> vector<8x384xf32>
    %10 = vector.extract_strided_slice %8 {offsets = [0, 0], sizes = [8, 128], strides = [1, 1]} : vector<8x384xf32> to vector<8x128xf32>
    %11 = vector.extract_strided_slice %8 {offsets = [0, 128], sizes = [8, 128], strides = [1, 1]} : vector<8x384xf32> to vector<8x128xf32>
    %12 = vector.extract_strided_slice %8 {offsets = [0, 256], sizes = [8, 128], strides = [1, 1]} : vector<8x384xf32> to vector<8x128xf32>
    %13 = vector.extract_strided_slice %9 {offsets = [0, 0], sizes = [8, 128], strides = [1, 1]} : vector<8x384xf32> to vector<8x128xf32>
    %14 = vector.extract_strided_slice %9 {offsets = [0, 128], sizes = [8, 128], strides = [1, 1]} : vector<8x384xf32> to vector<8x128xf32>
    %15 = vector.extract_strided_slice %9 {offsets = [0, 256], sizes = [8, 128], strides = [1, 1]} : vector<8x384xf32> to vector<8x128xf32>
    %16 = arith.addf %10, %13 : vector<8x128xf32>
    %17 = arith.negf %16 : vector<8x128xf32>
    %18 = math.exp %17 : vector<8x128xf32>
    %cst_12 = arith.constant 1.000000e+00 : f32
    %19 = vector.broadcast %cst_12 : f32 to vector<8x128xf32>
    %20 = arith.addf %19, %18 : vector<8x128xf32>
    %21 = arith.divf %19, %20 : vector<8x128xf32>
    %22 = arith.addf %11, %14 : vector<8x128xf32>
    %23 = arith.negf %22 : vector<8x128xf32>
    %24 = math.exp %23 : vector<8x128xf32>
    %cst_13 = arith.constant 1.000000e+00 : f32
    %25 = vector.broadcast %cst_13 : f32 to vector<8x128xf32>
    %26 = arith.addf %25, %24 : vector<8x128xf32>
    %27 = arith.divf %25, %26 : vector<8x128xf32>
    %28 = vector.broadcast %5 : vector<1x128xf32> to vector<8x128xf32>
    %29 = arith.addf %15, %28 : vector<8x128xf32>
    %30 = arith.mulf %21, %29 : vector<8x128xf32>
    %31 = arith.addf %12, %30 : vector<8x128xf32>
    %32 = math.tanh %31 : vector<8x128xf32>
    %33 = arith.subf %1, %32 : vector<8x128xf32>
    %34 = arith.mulf %27, %33 : vector<8x128xf32>
    %35 = arith.addf %32, %34 : vector<8x128xf32>
    %c0_14 = arith.constant 0 : index
    %c0_15 = arith.constant 0 : index
    %36 = vector.load %arg6[%c0_14, %c0_15] : memref<8x128xf32, #tpu.memory_space<vmem>>, vector<8x128xf32>
    tpu.vector_store %arg6[%c0_14, %c0_15], %35 {strides = array<i32>} : memref<8x128xf32, #tpu.memory_space<vmem>>, vector<8x128xf32>,
    return
  }
}

</mosaic_0001>

<bundles_post_ra>
// kernel: tpu_custom_call.1
= control target key start
LH: loop header
LB: loop body
LE: loop exit
PB: predicated region body
PF: predicated region fallthrough
CT: control target
= control target key end

     0   :  { %11 = vsyncpa [#allocation3], 0  ;;  %s860_s0 = inlined_call_operand.hbm [shape: f32[8,128], index: 0, kind: input, shape index: {}]   ;;  %s861_s1 = inlined_call_operand.hbm [shape: f32[8,128], index: 1, kind: input, shape index: {}]   ;;  %s862_s2 = inlined_call_operand.hbm [shape: f32[128,384], index: 2, kind: input, shape index: {}]   ;;  %s863_s3 = inlined_call_operand.hbm [shape: f32[128,384], index: 3, kind: input, shape index: {}]   ;;  %s864_s4 = inlined_call_operand.vmem [shape: f32[1,384], index: 4, kind: input, shape index: {}]   ;;  %s865_s5 = inlined_call_operand.vmem [shape: f32[1,128], index: 5, kind: input, shape index: {}]   ;;  %s866_s6 = inlined_call_operand.hbm [shape: f32[8,128], index: 6, kind: output, shape index: {}]  }
   0x1   :  { %12 = vsyncpa [#allocation6], 0 }
   0x2   :  { %13 = vsyncpa [#allocation9], 0 }
   0x3   :  { %14 = vsyncpa [#allocation4], 0  ;;  %s752_s21 = smov [#allocation5]   ;;  %s753_s23 = smov [#allocation2]  }
   0x4   :  { %s31_s22 = sshll.u32 %s752_s21, 4  ;;  %s21_s24 = sshll.u32 %s753_s23, 4  ;;  %s32_s22 = int_to_ptr.vmem [resolvable:$true] %s31_s22  ;;  %s22_s24 = int_to_ptr.vmem [resolvable:$true] %s21_s24 }
   0x5   :  { %s652_s25 = scalar_lea.vmem %s32_s22, 128  ;;  %p657_p1 = scmp.lt.s32.totalorder %s32_s22, %s32_s22 }
   0x6   :  { %p653_p0 = scmp.ne.s32.totalorder %s32_s22, %s652_s25  ;;  %p658_p2 = scmp.lt.s32.totalorder %s652_s25, %s652_s25 }
   0x8   :  { %p659_p3 = por %p658_p2, %p657_p1 }
   0xa   :  { %p660_p4 = pnand %p659_p3, %p653_p0 }
   0xc   :  { %663 = shalt.err (!%p660_p4)
}
   0xd   :  { %34 = dma.hbm_to_vmem [thread:$0]  %s861_s1, 128, %s32_s22, [#allocation6]  }
   0xe   :  { %s672_s28 = scalar_lea.vmem %s22_s24, 128  ;;  %p677_p6 = scmp.lt.s32.totalorder %s22_s24, %s22_s24 }
   0xf   :  { %p673_p5 = scmp.ne.s32.totalorder %s22_s24, %s672_s28  ;;  %p678_p7 = scmp.lt.s32.totalorder %s672_s28, %s672_s28 }
  0x11   :  { %p679_p8 = por %p678_p7, %p677_p6 }
  0x13   :  { %p680_p9 = pnand %p679_p8, %p673_p5 }
  0x15   :  { %683 = shalt.err (!%p680_p9)
}
  0x16   :  { %24 = dma.hbm_to_vmem [thread:$0]  %s860_s0, 128, %s22_s24, [#allocation3]  }
  0x17   :  { %s754_s7 = smov [#allocation7]  }
  0x18   :  { %s40_s8 = sshll.u32 %s754_s7, 4  ;;  %s41_s8 = int_to_ptr.vmem [resolvable:$true] %s40_s8 }
  0x19   :  { %s692_s9 = scalar_lea.vmem %s41_s8, 6144  ;;  %p697_p11 = scmp.lt.s32.totalorder %s41_s8, %s41_s8 }
  0x1a   :  { %p693_p10 = scmp.ne.s32.totalorder %s41_s8, %s692_s9  ;;  %p698_p12 = scmp.lt.s32.totalorder %s692_s9, %s692_s9 }
  0x1c   :  { %p699_p13 = por %p698_p12, %p697_p11 }
  0x1e   :  { %p700_p0 = pnand %p699_p13, %p693_p10 }
  0x20   :  { %703 = shalt.err (!%p700_p0)
}
  0x21   :  { %s755_s1 = smov 384   ;;  %s756_s10 = smov 24  }
  0x22   :  { %46 = dma.hbm_to_vmem [thread:$0]  %s862_s2, 6144, %s41_s8, [#allocation6], %s755_s1, %s755_s1, %s756_s10  }
  0x23   :  { %s757_s13 = smov [#allocation8]  }
  0x24   :  { %s52_s14 = sshll.u32 %s757_s13, 4  ;;  %s53_s14 = int_to_ptr.vmem [resolvable:$true] %s52_s14 }
  0x25   :  { %s712_s0 = scalar_lea.vmem %s53_s14, 6144  ;;  %p717_p2 = scmp.lt.s32.totalorder %s53_s14, %s53_s14 }
  0x26   :  { %p713_p1 = scmp.ne.s32.totalorder %s53_s14, %s712_s0  ;;  %p718_p3 = scmp.lt.s32.totalorder %s712_s0, %s712_s0 }
  0x28   :  { %p719_p4 = por %p718_p3, %p717_p2 }
  0x2a   :  { %p720_p5 = pnand %p719_p4, %p713_p1 }
  0x2c   :  { %723 = shalt.err (!%p720_p5)
}
  0x2d   :  { %58 = dma.hbm_to_vmem [thread:$0]  %s863_s3, 6144, %s53_s14, [#allocation9], %s755_s1, %s755_s1, %s756_s10  }
  0x2e   :  { %744 = dma.done.wait [#allocation3], 128  }
  0x2f   :  { %745 = vsyncadd [#allocation3], 4294967168 }
  0x30   :  { %746 = dma.done.wait [#allocation6], 6272  }
  0x31   :  { %747 = vsyncadd [#allocation6], 4294961024 }
  0x32   :  { %748 = dma.done.wait [#allocation9], 6144  }
  0x33   :  { %749 = vsyncadd [#allocation9], 4294961152  ;;  %v758_v0 = vmov 0.0   ;;  %vm759_vm0 = vmmov 0   ;;  %v123_v1 = vld [vmem:[#allocation7 + $0x170] sm:$0xff]  ;;  %v122_v2 = vld [vmem:[#allocation7 + $0x168] sm:$0xff] }
  0x34   :  { %555 = vmatprep.subr.mxu1 %v758_v0  ;;  %255 = vmatprep.mubr.f32.mxu0 %v758_v0  ;;  %v120_v3 = vld [vmem:[#allocation7 + $0x158] sm:$0xff]  ;;  %v119_v4 = vld [vmem:[#allocation7 + $0x150] sm:$0xff]  ;;  %v117_v5 = vld [vmem:[#allocation7 + $0x140] sm:$0xff]  ;;  %s760_s18 = smov [#allocation10]  }
  0x35   :  { %587 = vmatprep.mubr.msk.f32.mxu1 %vm759_vm0, %v758_v0  ;;  %191 = vmatprep.subr.mxu0 %v123_v1  ;;  %v116_v6 = vld [vmem:[#allocation7 + $0x138] sm:$0xff]  ;;  %v114_v7 = vld [vmem:[#allocation7 + $0x128] sm:$0xff]  ;;  %v113_v8 = vld [vmem:[#allocation7 + $0x120] sm:$0xff]  ;;  %s507_s19 = sshll.u32 %s760_s18, 4  ;;  %s508_s19 = int_to_ptr.vmem [resolvable:$true] %s507_s19 }
  0x36   :  { %192 = vmatpush1.msra.mxu0 %v122_v2  ;;  %v111_v9 = vld [vmem:[#allocation7 + $0x110] sm:$0xff]  ;;  %v110_v10 = vld [vmem:[#allocation7 + $0x108] sm:$0xff]  ;;  %v108_v11 = vld [vmem:[#allocation7 + $0xf8] sm:$0xff]  ;;  %p729_p7 = scmp.lt.s32.totalorder %s508_s19, %s508_s19 }
  0x37   :  { %193 = vmatprep.subr.mxu0 %v120_v3  ;;  %v107_v12 = vld [vmem:[#allocation7 + $0xf0] sm:$0xff]  ;;  %v105_v13 = vld [vmem:[#allocation7 + $0xe0] sm:$0xff]  ;;  %v124_v14 = vld [vmem:[#allocation7 + $0x178] sm:$0xff] }
  0x38   :  { %194 = vmatpush1.msra.mxu0 %v119_v4  ;;  %v104_v15 = vld [vmem:[#allocation7 + $0xd8] sm:$0xff]  ;;  %556 = vmatpush3.msra.mxu1 %v124_v14  ;;  %v121_v16 = vld [vmem:[#allocation7 + $0x160] sm:$0xff]  ;;  %v102_v17 = vld [vmem:[#allocation7 + $0xc8] sm:$0xff] }
  0x39   :  { %195 = vmatprep.subr.mxu0 %v117_v5  ;;  %557 = vmatprep.subr.mxu1 %v758_v0  ;;  %v118_v18 = vld [vmem:[#allocation7 + $0x148] sm:$0xff]  ;;  %v101_v19 = vld [vmem:[#allocation7 + $0xc0] sm:$0xff]  ;;  %v99_v20 = vld [vmem:[#allocation7 + $0xb0] sm:$0xff] }
  0x3a   :  { %196 = vmatpush1.msra.mxu0 %v116_v6  ;;  %558 = vmatpush3.msra.mxu1 %v121_v16  ;;  %v115_v21 = vld [vmem:[#allocation7 + $0x130] sm:$0xff]  ;;  %v98_v22 = vld [vmem:[#allocation7 + $0xa8] sm:$0xff]  ;;  %v96_v23 = vld [vmem:[#allocation7 + $0x98] sm:$0xff] }
  0x3b   :  { %197 = vmatprep.subr.mxu0 %v114_v7  ;;  %559 = vmatprep.subr.mxu1 %v758_v0  ;;  %v112_v24 = vld [vmem:[#allocation7 + $0x118] sm:$0xff]  ;;  %v95_v25 = vld [vmem:[#allocation7 + $0x90] sm:$0xff]  ;;  %v93_v26 = vld [vmem:[#allocation7 + $0x80] sm:$0xff] }
  0x3c   :  { %198 = vmatpush1.msra.mxu0 %v113_v8  ;;  %560 = vmatpush3.msra.mxu1 %v118_v18  ;;  %v109_v27 = vld [vmem:[#allocation7 + $0x100] sm:$0xff]  ;;  %v92_v28 = vld [vmem:[#allocation7 + $0x78] sm:$0xff]  ;;  %v90_v29 = vld [vmem:[#allocation7 + $0x68] sm:$0xff] }
  0x3d   :  { %199 = vmatprep.subr.mxu0 %v111_v9  ;;  %561 = vmatprep.subr.mxu1 %v758_v0  ;;  %v106_v30 = vld [vmem:[#allocation7 + $0xe8] sm:$0xff]  ;;  %v89_v31 = vld [vmem:[#allocation7 + $0x60] sm:$0xff]  ;;  %v87_v32 = vld [vmem:[#allocation7 + $0x50] sm:$0xff] }
  0x3e   :  { %200 = vmatpush1.msra.mxu0 %v110_v10  ;;  %562 = vmatpush3.msra.mxu1 %v115_v21  ;;  %v103_v33 = vld [vmem:[#allocation7 + $0xd0] sm:$0xff]  ;;  %v86_v34 = vld [vmem:[#allocation7 + $0x48] sm:$0xff]  ;;  %v84_v35 = vld [vmem:[#allocation7 + $0x38] sm:$0xff] }
  0x3f   :  { %201 = vmatprep.subr.mxu0 %v108_v11  ;;  %563 = vmatprep.subr.mxu1 %v758_v0  ;;  %v100_v36 = vld [vmem:[#allocation7 + $0xb8] sm:$0xff]  ;;  %v83_v37 = vld [vmem:[#allocation7 + $0x30] sm:$0xff]  ;;  %v81_v38 = vld [vmem:[#allocation7 + $0x20] sm:$0xff] }
  0x40   :  { %202 = vmatpush1.msra.mxu0 %v107_v12  ;;  %564 = vmatpush3.msra.mxu1 %v112_v24  ;;  %v97_v39 = vld [vmem:[#allocation7 + $0xa0] sm:$0xff]  ;;  %v80_v40 = vld [vmem:[#allocation7 + $0x18] sm:$0xff]  ;;  %v78_v41 = vld [vmem:[#allocation7 + $0x8] sm:$0xff] }
  0x41   :  { %203 = vmatprep.subr.mxu0 %v105_v13  ;;  %565 = vmatprep.subr.mxu1 %v758_v0  ;;  %v94_v42 = vld [vmem:[#allocation7 + $0x88] sm:$0xff]  ;;  %v77_v43 = vld [vmem:[#allocation7] sm:$0xff]  ;;  %v75_v44 = vld [vmem:[#allocation2] sm:$0xff] }
  0x42   :  { %204 = vmatpush1.msra.mxu0 %v104_v15  ;;  %566 = vmatpush3.msra.mxu1 %v109_v27  ;;  %v171_v45 = vld [vmem:[#allocation8 + $0x170] sm:$0xff]  ;;  %v170_v46 = vld [vmem:[#allocation8 + $0x168] sm:$0xff]  ;;  %v168_v48 = vld [vmem:[#allocation8 + $0x158] sm:$0xff] }
  0x43   :  { %205 = vmatprep.subr.mxu0 %v102_v17  ;;  %567 = vmatprep.subr.mxu1 %v758_v0  ;;  %v91_v47 = vld [vmem:[#allocation7 + $0x70] sm:$0xff]  ;;  %v88_v50 = vld [vmem:[#allocation7 + $0x58] sm:$0xff]  ;;  %v165_v51 = vld [vmem:[#allocation8 + $0x140] sm:$0xff] }
  0x44   :  { %206 = vmatpush1.msra.mxu0 %v101_v19  ;;  %568 = vmatpush3.msra.mxu1 %v106_v30  ;;  %v167_v49 = vld [vmem:[#allocation8 + $0x150] sm:$0xff]  ;;  %v164_v52 = vld [vmem:[#allocation8 + $0x138] sm:$0xff]  ;;  %v85_v53 = vld [vmem:[#allocation7 + $0x40] sm:$0xff] }
  0x45   :  { %207 = vmatprep.subr.mxu0 %v99_v20  ;;  %569 = vmatprep.subr.mxu1 %v758_v0  ;;  %v162_v54 = vld [vmem:[#allocation8 + $0x128] sm:$0xff]  ;;  %v161_v55 = vld [vmem:[#allocation8 + $0x120] sm:$0xff]  ;;  %v159_v57 = vld [vmem:[#allocation8 + $0x110] sm:$0xff] }
  0x46   :  { %208 = vmatpush1.msra.mxu0 %v98_v22  ;;  %570 = vmatpush3.msra.mxu1 %v103_v33  ;;  %v82_v56 = vld [vmem:[#allocation7 + $0x28] sm:$0xff]  ;;  %v79_v59 = vld [vmem:[#allocation7 + $0x10] sm:$0xff]  ;;  %v156_v60 = vld [vmem:[#allocation8 + $0xf8] sm:$0xff] }
  0x47   :  { %209 = vmatprep.subr.mxu0 %v96_v23  ;;  %571 = vmatprep.subr.mxu1 %v758_v0  ;;  %v158_v58 = vld [vmem:[#allocation8 + $0x108] sm:$0xff]  ;;  %v155_v61 = vld [vmem:[#allocation8 + $0xf0] sm:$0xff]  ;;  %v153_v62 = vld [vmem:[#allocation8 + $0xe0] sm:$0xff] }
  0x48   :  { %210 = vmatpush1.msra.mxu0 %v95_v25  ;;  %572 = vmatpush3.msra.mxu1 %v100_v36  ;;  %v152_v63 = vld [vmem:[#allocation8 + $0xd8] sm:$0xff]  ;;  %v150_v2 = vld [vmem:[#allocation8 + $0xc8] sm:$0xff]  ;;  %v149_v3 = vld [vmem:[#allocation8 + $0xc0] sm:$0xff] }
  0x49   :  { %211 = vmatprep.subr.mxu0 %v93_v26  ;;  %573 = vmatprep.subr.mxu1 %v758_v0  ;;  %v172_v1 = vld [vmem:[#allocation8 + $0x178] sm:$0xff]  ;;  %v169_v4 = vld [vmem:[#allocation8 + $0x160] sm:$0xff]  ;;  %v147_v5 = vld [vmem:[#allocation8 + $0xb0] sm:$0xff] }
  0x4a   :  { %212 = vmatpush1.msra.mxu0 %v92_v28  ;;  %574 = vmatpush3.msra.mxu1 %v97_v39  ;;  %v146_v6 = vld [vmem:[#allocation8 + $0xa8] sm:$0xff]  ;;  %v144_v8 = vld [vmem:[#allocation8 + $0x98] sm:$0xff]  ;;  %v143_v9 = vld [vmem:[#allocation8 + $0x90] sm:$0xff] }
  0x4b   :  { %213 = vmatprep.subr.mxu0 %v90_v29  ;;  %575 = vmatprep.subr.mxu1 %v758_v0  ;;  %v166_v7 = vld [vmem:[#allocation8 + $0x148] sm:$0xff]  ;;  %v163_v10 = vld [vmem:[#allocation8 + $0x130] sm:$0xff]  ;;  %v141_v11 = vld [vmem:[#allocation8 + $0x80] sm:$0xff] }
  0x4c   :  { %214 = vmatpush1.msra.mxu0 %v89_v31  ;;  %576 = vmatpush3.msra.mxu1 %v94_v42  ;;  %v140_v12 = vld [vmem:[#allocation8 + $0x78] sm:$0xff]  ;;  %v138_v14 = vld [vmem:[#allocation8 + $0x68] sm:$0xff]  ;;  %v137_v15 = vld [vmem:[#allocation8 + $0x60] sm:$0xff] }
  0x4d   :  { %215 = vmatprep.subr.mxu0 %v87_v32  ;;  %577 = vmatprep.subr.mxu1 %v758_v0  ;;  %v160_v13 = vld [vmem:[#allocation8 + $0x118] sm:$0xff]  ;;  %v157_v16 = vld [vmem:[#allocation8 + $0x100] sm:$0xff]  ;;  %v135_v17 = vld [vmem:[#allocation8 + $0x50] sm:$0xff] }
  0x4e   :  { %216 = vmatpush1.msra.mxu0 %v86_v34  ;;  %578 = vmatpush3.msra.mxu1 %v91_v47  ;;  %v134_v18 = vld [vmem:[#allocation8 + $0x48] sm:$0xff]  ;;  %v132_v20 = vld [vmem:[#allocation8 + $0x38] sm:$0xff]  ;;  %v131_v21 = vld [vmem:[#allocation8 + $0x30] sm:$0xff] }
  0x4f   :  { %217 = vmatprep.subr.mxu0 %v84_v35  ;;  %579 = vmatprep.subr.mxu1 %v758_v0  ;;  %v154_v19 = vld [vmem:[#allocation8 + $0xe8] sm:$0xff]  ;;  %v151_v22 = vld [vmem:[#allocation8 + $0xd0] sm:$0xff]  ;;  %v129_v23 = vld [vmem:[#allocation8 + $0x20] sm:$0xff] }
  0x50   :  { %218 = vmatpush1.msra.mxu0 %v83_v37  ;;  %580 = vmatpush3.msra.mxu1 %v88_v50  ;;  %v128_v24 = vld [vmem:[#allocation8 + $0x18] sm:$0xff]  ;;  %v126_v26 = vld [vmem:[#allocation8 + $0x8] sm:$0xff]  ;;  %v125_v27 = vld [vmem:[#allocation8] sm:$0xff] }
  0x51   :  { %219 = vmatprep.subr.mxu0 %v81_v38  ;;  %581 = vmatprep.subr.mxu1 %v758_v0  ;;  %v148_v25 = vld [vmem:[#allocation8 + $0xb8] sm:$0xff]  ;;  %v145_v28 = vld [vmem:[#allocation8 + $0xa0] sm:$0xff]  ;;  %v142_v30 = vld [vmem:[#allocation8 + $0x88] sm:$0xff]  ;;  %v176_v38 = vlaneseq }
  0x52   :  { %220 = vmatpush1.msra.mxu0 %v80_v40  ;;  %582 = vmatpush3.msra.mxu1 %v85_v53  ;;  %v837_v29 = vld [vmem:[#allocation5] sm:$0xff]  ;;  %v139_v31 = vld [vmem:[#allocation8 + $0x70] sm:$0xff]  ;;  %v133_v33 = vld [vmem:[#allocation8 + $0x40] sm:$0xff] }
  0x53   :  { %221 = vmatprep.subr.mxu0 %v78_v41  ;;  %583 = vmatprep.subr.mxu1 %v758_v0  ;;  %v136_v32 = vld [vmem:[#allocation8 + $0x58] sm:$0xff]  ;;  %v130_v34 = vld [vmem:[#allocation8 + $0x28] sm:$0xff]  ;;  %v127_v35 = vld [vmem:[#allocation8 + $0x10] sm:$0xff]  ;;  %v177_v39 = vshrl.u32 %v176_v38, 7 }
  0x54   :  { %222 = vmatpush1.msra.mxu0 %v77_v43  ;;  %584 = vmatpush3.msra.mxu1 %v82_v56  ;;  %v173_v41 = vld [vmem:[%s864_s4] sm:$0x7] }
  0x55   :  { %256 = vmatmul.mubr.f32.vlgmr.msra.gmra.mxu0 %v75_v44  ;;  %332 = vmatprep.subr.mxu0 %v171_v45  ;;  %v178_v40 = vsub.s32 0, %v177_v39 }
  0x56   :  { %333 = vmatpush1.msra.mxu0 %v170_v46  ;;  %585 = vmatprep.subr.mxu1 %v758_v0 }
  0x57   :  { %334 = vmatprep.subr.mxu0 %v168_v48  ;;  %586 = vmatpush3.msra.mxu1 %v79_v59  ;;  %v179_v43 = vrot.slane %v173_v41, %v178_v40  ;;  %v182_v48 = vsub.s32 1, %v177_v39  ;;  %v520_v59 = vld [vmem:[%s865_s5] ss:$0 sm:$0xff]  ;;  %s724_s5 = scalar_lea.vmem %s508_s19, 128 }
  0x58   :  { %335 = vmatpush1.msra.mxu0 %v167_v49  ;;  %590 = vmatprep.subr.mxu1 %v758_v0  ;;  %p725_p6 = scmp.ne.s32.totalorder %s508_s19, %s724_s5  ;;  %p730_p8 = scmp.lt.s32.totalorder %s724_s5, %s724_s5 }
  0x59   :  { %336 = vmatprep.subr.mxu0 %v165_v51  ;;  %588 = vmatmul.mubr.f32.vlgmr.msra.gmra.mxu1 %v75_v44  ;;  %v183_v49 = vrot.slane %v173_v41, %v182_v48 }
  0x5a   :  { %337 = vmatpush1.msra.mxu0 %v164_v52  ;;  %396 = vmatprep.mubr.f32.mxu0 %v758_v0  ;;  %p731_p9 = por %p730_p8, %p729_p7 }
  0x5b   :  { %338 = vmatprep.subr.mxu0 %v162_v54  ;;  %591 = vmatpush3.msra.mxu1 %v172_v1 }
  0x5c   :  { %339 = vmatpush1.msra.mxu0 %v161_v55  ;;  %592 = vmatprep.subr.mxu1 %v758_v0  ;;  %p732_p10 = pnand %p731_p9, %p725_p6 }
  0x5d   :  { %340 = vmatprep.subr.mxu0 %v159_v57  ;;  %593 = vmatpush3.msra.mxu1 %v169_v4 }
  0x5e   :  { %341 = vmatpush1.msra.mxu0 %v158_v58  ;;  %594 = vmatprep.subr.mxu1 %v758_v0  ;;  %v186_v58 = vsub.s32 2, %v177_v39 }
  0x5f   :  { %342 = vmatprep.subr.mxu0 %v156_v60  ;;  %595 = vmatpush3.msra.mxu1 %v166_v7 }
  0x60   :  { %343 = vmatpush1.msra.mxu0 %v155_v61  ;;  %596 = vmatprep.subr.mxu1 %v758_v0  ;;  %v187_v60 = vrot.slane %v173_v41, %v186_v58 }
  0x61   :  { %344 = vmatprep.subr.mxu0 %v153_v62  ;;  %597 = vmatpush3.msra.mxu1 %v163_v10 }
  0x62   :  { %345 = vmatpush1.msra.mxu0 %v152_v63  ;;  %598 = vmatprep.subr.mxu1 %v758_v0 }
  0x63   :  { %346 = vmatprep.subr.mxu0 %v150_v2  ;;  %599 = vmatpush3.msra.mxu1 %v160_v13 }
  0x64   :  { %347 = vmatpush1.msra.mxu0 %v149_v3  ;;  %600 = vmatprep.subr.mxu1 %v758_v0 }
  0x65   :  { %348 = vmatprep.subr.mxu0 %v147_v5  ;;  %601 = vmatpush3.msra.mxu1 %v157_v16 }
  0x66   :  { %349 = vmatpush1.msra.mxu0 %v146_v6  ;;  %602 = vmatprep.subr.mxu1 %v758_v0 }
  0x67   :  { %350 = vmatprep.subr.mxu0 %v144_v8  ;;  %603 = vmatpush3.msra.mxu1 %v154_v19 }
  0x68   :  { %351 = vmatpush1.msra.mxu0 %v143_v9  ;;  %604 = vmatprep.subr.mxu1 %v758_v0 }
  0x69   :  { %352 = vmatprep.subr.mxu0 %v141_v11  ;;  %605 = vmatpush3.msra.mxu1 %v151_v22 }
  0x6a   :  { %353 = vmatpush1.msra.mxu0 %v140_v12  ;;  %606 = vmatprep.subr.mxu1 %v758_v0 }
  0x6b   :  { %354 = vmatprep.subr.mxu0 %v138_v14  ;;  %607 = vmatpush3.msra.mxu1 %v148_v25 }
  0x6c   :  { %355 = vmatpush1.msra.mxu0 %v137_v15  ;;  %608 = vmatprep.subr.mxu1 %v758_v0 }
  0x6d   :  { %356 = vmatprep.subr.mxu0 %v135_v17  ;;  %609 = vmatpush3.msra.mxu1 %v145_v28 }
  0x6e   :  { %357 = vmatpush1.msra.mxu0 %v134_v18  ;;  %610 = vmatprep.subr.mxu1 %v758_v0 }
  0x6f   :  { %358 = vmatprep.subr.mxu0 %v132_v20  ;;  %611 = vmatpush3.msra.mxu1 %v142_v30 }
  0x70   :  { %359 = vmatpush1.msra.mxu0 %v131_v21  ;;  %622 = vmatprep.mubr.msk.f32.mxu1 %vm759_vm0, %v758_v0 }
  0x71   :  { %360 = vmatprep.subr.mxu0 %v129_v23  ;;  %612 = vmatprep.subr.mxu1 %v758_v0 }
  0x72   :  { %361 = vmatpush1.msra.mxu0 %v128_v24  ;;  %613 = vmatpush3.msra.mxu1 %v139_v31 }
  0x73   :  { %362 = vmatprep.subr.mxu0 %v126_v26  ;;  %614 = vmatprep.subr.mxu1 %v758_v0 }
  0x74   :  { %363 = vmatpush1.msra.mxu0 %v125_v27  ;;  %615 = vmatpush3.msra.mxu1 %v136_v32 }
  0x75   :  { %397 = vmatmul.mubr.f32.vlgmr.msra.gmra.mxu0 %v837_v29  ;;  %616 = vmatprep.subr.mxu1 %v758_v0 }
  0x76   :  { %617 = vmatpush3.msra.mxu1 %v133_v33 }
  0x77   :  { %618 = vmatprep.subr.mxu1 %v758_v0 }
  0x78   :  { %619 = vmatpush3.msra.mxu1 %v130_v34 }
  0x79   :  { %620 = vmatprep.subr.mxu1 %v758_v0 }
  0x7a   :  { %621 = vmatpush3.msra.mxu1 %v127_v35 }
  0x7b   :  { %623 = vmatmul.mubr.f32.vlgmr.msra.gmra.mxu1 %v837_v29 }
 0x115   :  { %v257_v42 = vpop.f32.mrf.mxu0 }
 0x116   :  { %v258_v45 = vadd.f32 %v257_v42, %v179_v43 }
 0x117   :  { %v259_v44 = vpop.f32.mrf.mxu0 }
 0x118   :  { %v260_v51 = vadd.f32 %v259_v44, %v183_v49 }
 0x119   :  { %v328_v36 = vpop.f32.mrf.mxu1 }
 0x11a   :  { %v329_v1 = vadd.f32 %v328_v36, %v187_v60 }
 0x11b   :  { %v589_v37 = vpop.f32.mrf.mxu1 }
 0x135   :  { %v398_v46 = vpop.f32.mrf.mxu0 }
 0x136   :  { %v473_v47 = vadd.f32 %v398_v46, %v258_v45 }
 0x137   :  { %v400_v50 = vpop.f32.mrf.mxu0 }
 0x138   :  { %v518_v0 = vmul.f32 -1.442695, %v473_v47  ;;  %v480_v52 = vadd.f32 %v400_v50, %v260_v51 }
 0x13a   :  { %634 = vpow2.f32 %v518_v0  ;;  %v519_v55 = vmul.f32 -1.442695, %v480_v52 }
 0x13b   :  { %v469_v53 = vpop.f32.mrf.mxu1 }
 0x13c   :  { %636 = vpow2.f32 %v519_v55  ;;  %v493_v61 = vadd.f32 %v520_v59, %v469_v53 }
 0x13d   :  { %v624_v54 = vpop.f32.mrf.mxu1 }
 0x147   :  { %v635_v56 = vpop.eup %634 }
 0x148   :  { %v477_v57 = vadd.f32 1.0, %v635_v56 }
 0x149   :  { %v637_v62 = vpop.eup %636 }
 0x14a   :  { %638 = vrcp.f32 %v477_v57  ;;  %v484_v3 = vadd.f32 1.0, %v637_v62 }
 0x157   :  { %v639_v63 = vpop.eup %638 }
 0x158   :  { %v494_v2 = vmul.f32 %v639_v63, %v493_v61 }
 0x15a   :  { %v495_v4 = vadd.f32 %v494_v2, %v329_v1 }
 0x15c   :  { %640 = vtanh.f32 %v495_v4 }
 0x15d   :  { %642 = vrcp.f32 %v484_v3 }
 0x169   :  { %v641_v5 = vpop.eup %640 }
 0x16a   :  { %v497_v6 = vsub.f32 %v837_v29, %v641_v5  ;;  %v643_v7 = vpop.eup %642 }
 0x16c   :  { %v498_v8 = vmul.f32 %v643_v7, %v497_v6 }
 0x16e   :  { %v499_v9 = vadd.f32 %v641_v5, %v498_v8 }
 0x170   :  { %500 = vst [vmem:[#allocation10] sm:$0xff] %v499_v9 }
 0x171   :  { %735 = shalt.err (!%p732_p10)
}
 0x172   :  { %510 = dma.vmem_to_hbm [thread:$0]  %s508_s19, 128, %s866_s6, [#allocation4]  }
 0x173   :  { %750 = dma.done.wait [#allocation4], 128  }
 0x174   :  { %751 = vsyncadd [#allocation4], 4294967168 }
 0x175   :  { %514 = vsyncpa [#allocation3], 1 }
 0x176   :  { %515 = vsyncpa [#allocation6], 1 }
 0x177   :  { %516 = vsyncpa [#allocation9], 1 }
 0x178   :  { %517 = vsyncpa [#allocation4], 1 }

</bundles_post_ra>
